<compile_context>
chip_gen: v6e
topology: v6e:2x2x1
jax: 0.10.0
libtpu: 0.0.40
codegen_flags: <defaults>
</compile_context>

<pallas_src>
import functools

import jax
import jax.numpy as jnp
from jax import lax
from jax.experimental import pallas as pl
from jax.experimental.pallas import tpu as pltpu


def _round_up(x, m):
    return ((x + m - 1) // m) * m


def _choose_tile_d(n, d, itemsize):
    # Byte-budgeted tile: ~4 MiB per input block (x2 double buffering =>
    # ~8 MiB), comfortably under the scoped-VMEM defaults on v5e/v6e/v7x
    # while keeping the stream at the HBM roofline.  No lane cap.
    target_bytes = 4 * 1024 * 1024
    tile = target_bytes // max(1, n * itemsize)
    tile = max(128, (tile // 128) * 128)        # lane-dense (multiple of 128)
    tile = min(tile, _round_up(d, 128))         # never exceed the problem
    return tile


def _sep_moments_kernel(h_ref, mn_out, mx_out, s_out, gram_out,
                        mn_sc, mx_sc, s_sc, gram_sc,
                        *, tile_d, d, tiles_per_split, needs_mask, dot_dtype):
    c = pl.program_id(0)     # D-stream split (maps to a TensorCore on v7x)
    k = pl.program_id(1)     # tile index within this split

    @pl.when(k == 0)
    def _init():
        mn_sc[...] = jnp.full_like(mn_sc, jnp.inf)
        mx_sc[...] = jnp.full_like(mx_sc, -jnp.inf)
        s_sc[...] = jnp.zeros_like(s_sc)
        gram_sc[...] = jnp.zeros_like(gram_sc)

    h_nat = h_ref[...]       # native HBM dtype (bf16 stays bf16 over the DMA)

    def accumulate(h_dot, h_f32, h_lo, h_hi):
        mn_sc[...] = jnp.minimum(
            mn_sc[...], jnp.min(h_lo, axis=1, keepdims=True).astype(jnp.float32))
        mx_sc[...] = jnp.maximum(
            mx_sc[...], jnp.max(h_hi, axis=1, keepdims=True).astype(jnp.float32))
        s_sc[...] = s_sc[...] + jnp.sum(h_f32, axis=1, keepdims=True)
        # bf16 operands, f32 accumulation: single MXU pass.
        gram_sc[...] = gram_sc[...] + lax.dot_general(
            h_dot, h_dot,
            dimension_numbers=(((1,), (1,)), ((), ())),
            preferred_element_type=jnp.float32)

    if needs_mask:
        # Global tile index; can run past the real data on the final partial
        # tile or on padding tiles of the second split.
        g_tile = c * tiles_per_split + k
        n_valid = jnp.clip(d - g_tile * tile_d, 0, tile_d)

        @pl.when(n_valid == tile_d)      # interior tiles: no masking cost
        def _full_tile():
            accumulate(h_nat.astype(dot_dtype),
                       h_nat.astype(jnp.float32), h_nat, h_nat)

        @pl.when(n_valid < tile_d)       # tail / fully-OOB tiles only
        def _tail_tile():
            lane = lax.broadcasted_iota(jnp.int32, h_nat.shape, 1)
            valid = lane < n_valid
            zero = jnp.zeros((), dtype=h_nat.dtype)
            pos = jnp.asarray(jnp.inf, dtype=h_nat.dtype)
            neg = jnp.asarray(-jnp.inf, dtype=h_nat.dtype)
            h_z = jnp.where(valid, h_nat, zero)          # neutral for sum/Gram
            accumulate(h_z.astype(dot_dtype),
                       h_z.astype(jnp.float32),
                       jnp.where(valid, h_nat, pos),     # neutral for min
                       jnp.where(valid, h_nat, neg))     # neutral for max
    else:
        accumulate(h_nat.astype(dot_dtype),
                   h_nat.astype(jnp.float32), h_nat, h_nat)

    @pl.when(k == pl.num_programs(1) - 1)
    def _write():
        mn_out[0] = mn_sc[...]
        mx_out[0] = mx_sc[...]
        s_out[0] = s_sc[...]
        gram_out[0] = gram_sc[...]


def separation_loss(heatmaps, *, tile_d=None):
    """heatmaps: (N, H, W) (or any (N, ...)); returns scalar f32 loss."""
    n = heatmaps.shape[0]
    flat = heatmaps.reshape(n, -1)        # keep HBM dtype; no padded HBM copy
    d = flat.shape[1]

    if tile_d is None:
        tile_d = _choose_tile_d(n, d, jnp.dtype(flat.dtype).itemsize)
    tiles_total = pl.cdiv(d, tile_d)
    num_splits = 2 if tiles_total >= 2 else 1       # feed both v7x TensorCores
    tiles_per_split = pl.cdiv(tiles_total, num_splits)
    needs_mask = (num_splits * tiles_per_split * tile_d) != d

    # Deliberate MXU precision choice: bf16 operands + f32 accumulation
    # (single pass).  Sub-f32 inputs are fed natively.
    dot_dtype = jnp.bfloat16 if flat.dtype == jnp.float32 else flat.dtype

    kernel = functools.partial(
        _sep_moments_kernel, tile_d=tile_d, d=d,
        tiles_per_split=tiles_per_split, needs_mask=needs_mask,
        dot_dtype=dot_dtype)

    def in_map(c, k):
        g_tile = c * tiles_per_split + k
        # Clamp so the DMA never walks past the last real tile; any over-read
        # columns are masked to neutral values inside the kernel.
        return (0, jnp.minimum(g_tile, tiles_total - 1))

    moment_spec = pl.BlockSpec((1, n, 1), lambda c, k: (c, 0, 0))

    mn_p, mx_p, s_p, gram_p = pl.pallas_call(
        kernel,
        out_shape=(
            jax.ShapeDtypeStruct((num_splits, n, 1), jnp.float32),
            jax.ShapeDtypeStruct((num_splits, n, 1), jnp.float32),
            jax.ShapeDtypeStruct((num_splits, n, 1), jnp.float32),
            jax.ShapeDtypeStruct((num_splits, n, n), jnp.float32),
        ),
        grid=(num_splits, tiles_per_split),
        in_specs=[pl.BlockSpec((n, tile_d), in_map)],
        out_specs=(
            moment_spec, moment_spec, moment_spec,
            pl.BlockSpec((1, n, n), lambda c, k: (c, 0, 0)),
        ),
        scratch_shapes=[
            pltpu.VMEM((n, 1), jnp.float32),   # running min
            pltpu.VMEM((n, 1), jnp.float32),   # running max
            pltpu.VMEM((n, 1), jnp.float32),   # running sum
            pltpu.VMEM((n, n), jnp.float32),   # running raw Gram
        ],
        compiler_params=pltpu.CompilerParams(
            dimension_semantics=("parallel", "arbitrary")),
    )(flat)

    # Merge per-split partials (exact: min/max/add are associative), then the
    # tiny O(N^2) algebraic finalize in plain XLA.
    mn = jnp.min(mn_p, axis=0)                # (N, 1)
    mx = jnp.max(mx_p, axis=0)
    s = jnp.sum(s_p, axis=0)
    gram = jnp.sum(gram_p, axis=0)            # (N, N)

    r = 1.0 / (mx - mn + 1e-8)
    d_f = jnp.float32(d)
    t = gram - s * mn.T - mn * s.T + d_f * (mn * mn.T)   # sum_x (h_i-mn_i)(h_j-mn_j)
    g = (r * r.T) * t                                    # sum_x a_i a_j
    mask = jnp.tril(jnp.ones((n, n), dtype=bool), k=-1)  # strict lower triangle
    return jnp.sum(jnp.where(mask, g, 0.0))


def _reference(heatmaps):
    # Mirrors the PyTorch module directly (normalize, elementwise overlaps,
    # strict-lower-triangle sum), all in f32.
    n = heatmaps.shape[0]
    flat = heatmaps.reshape(n, -1).astype(jnp.float32)
    mn = jnp.min(flat, axis=1, keepdims=True)
    mx = jnp.max(flat, axis=1, keepdims=True)
    a = (flat - mn) / (mx - mn + 1e-8)
    overlaps = jnp.sum(a[:, None, :] * a[None, :, :], axis=-1)   # (N, N)
    mask = jnp.tril(jnp.ones((n, n), dtype=bool), k=-1)
    return jnp.sum(jnp.where(mask, overlaps, 0.0))


if __name__ == "__main__":
    key = jax.random.PRNGKey(0)
    k1, k2, k3 = jax.random.split(key, 3)

    # 1) Primary: 4 heatmaps of 16x16 (D=256 -> single clean tile, no mask).
    h1 = jax.random.normal(k1, (4, 16, 16), dtype=jnp.float32)
    out1 = jax.block_until_ready(separation_loss(h1))
    ref1 = _reference(h1)
    assert jnp.allclose(out1, ref1, rtol=1e-3, atol=1e-2), (out1, ref1)

    # 2) Larger D, auto-tiled (single large lane-dense tile, no HBM padding).
    h2 = jax.random.normal(k2, (4, 160, 160), dtype=jnp.float32)
    out2 = jax.block_until_ready(separation_loss(h2))
    ref2 = _reference(h2)
    assert jnp.allclose(out2, ref2, rtol=1e-3, atol=1e-1), (out2, ref2)

    # 3) Forced small tile: exercises the 2-way split, multi-tile streaming,
    #    and the masked partial tail (D=10000 -> 10 tiles of 1024, tail 784).
    h3 = jax.random.normal(k3, (4, 100, 100), dtype=jnp.float32)
    out3 = jax.block_until_ready(separation_loss(h3, tile_d=1024))
    ref3 = _reference(h3)
    assert jnp.allclose(out3, ref3, rtol=1e-3, atol=1e-1), (out3, ref3)

    # 4) Native bf16 input path (no upcast before the Gram matmul).
    h4 = h1.astype(jnp.bfloat16)
    out4 = jax.block_until_ready(separation_loss(h4))
    ref4 = _reference(h4)
    assert jnp.allclose(out4, ref4, rtol=1e-3, atol=1e-1), (out4, ref4)

    print("KERNEL_OK")
</pallas_src>

<mosaic_0001>
module attributes {stable_mosaic.version = 11 : i64} {
  func.func @_sep_moments_kernel(%arg0: i32, %arg1: i32, %arg2: memref<4x256xf32, #tpu.memory_space<vmem>>, %arg3: memref<1x4x1xf32, #tpu.memory_space<vmem>>, %arg4: memref<1x4x1xf32, #tpu.memory_space<vmem>>, %arg5: memref<1x4x1xf32, #tpu.memory_space<vmem>>, %arg6: memref<1x4x4xf32, #tpu.memory_space<vmem>>, %arg7: memref<4x1xf32, #tpu.memory_space<vmem>>, %arg8: memref<4x1xf32, #tpu.memory_space<vmem>>, %arg9: memref<4x1xf32, #tpu.memory_space<vmem>>, %arg10: memref<4x4xf32, #tpu.memory_space<vmem>>) attributes {dimension_semantics = [#tpu.dimension_semantics<parallel>, #tpu.dimension_semantics<arbitrary>], iteration_bounds = array<i64: 1, 1>, scalar_prefetch = 0 : i64, scratch_operands = 4 : i64, tpu.core_type = #tpu.core_type<tc>, window_params = [{transform_indices = @transform_0, window_bounds = array<i64: 4, 256>}, {transform_indices = @transform_1, window_bounds = array<i64: 1, 4, 1>}, {transform_indices = @transform_2, window_bounds = array<i64: 1, 4, 1>}, {transform_indices = @transform_3, window_bounds = array<i64: 1, 4, 1>}, {transform_indices = @transform_4, window_bounds = array<i64: 1, 4, 4>}]} {
    %c0_i32 = arith.constant 0 : i32
    %0 = arith.cmpi eq, %arg1, %c0_i32 : i32
    %1 = arith.extui %0 : i1 to i32
    %c0_i32_0 = arith.constant 0 : i32
    %2 = arith.cmpi ne, %1, %c0_i32_0 : i32
    scf.if %2 {
      %cst_23 = arith.constant 0x7F800000 : f32
      %27 = vector.broadcast %cst_23 : f32 to vector<4x1xf32>
      %c0_24 = arith.constant 0 : index
      %c0_25 = arith.constant 0 : index
      %28 = vector.load %arg7[%c0_24, %c0_25] : memref<4x1xf32, #tpu.memory_space<vmem>>, vector<4x1xf32>
      tpu.vector_store %arg7[%c0_24, %c0_25], %27 {strides = array<i32>} : memref<4x1xf32, #tpu.memory_space<vmem>>, vector<4x1xf32>,
      %cst_26 = arith.constant 0xFF800000 : f32
      %29 = vector.broadcast %cst_26 : f32 to vector<4x1xf32>
      %c0_27 = arith.constant 0 : index
      %c0_28 = arith.constant 0 : index
      %30 = vector.load %arg8[%c0_27, %c0_28] : memref<4x1xf32, #tpu.memory_space<vmem>>, vector<4x1xf32>
      tpu.vector_store %arg8[%c0_27, %c0_28], %29 {strides = array<i32>} : memref<4x1xf32, #tpu.memory_space<vmem>>, vector<4x1xf32>,
      %cst_29 = arith.constant 0.000000e+00 : f32
      %31 = vector.broadcast %cst_29 : f32 to vector<4x1xf32>
      %c0_30 = arith.constant 0 : index
      %c0_31 = arith.constant 0 : index
      %32 = vector.load %arg9[%c0_30, %c0_31] : memref<4x1xf32, #tpu.memory_space<vmem>>, vector<4x1xf32>
      tpu.vector_store %arg9[%c0_30, %c0_31], %31 {strides = array<i32>} : memref<4x1xf32, #tpu.memory_space<vmem>>, vector<4x1xf32>,
      %cst_32 = arith.constant 0.000000e+00 : f32
      %33 = vector.broadcast %cst_32 : f32 to vector<4x4xf32>
      %c0_33 = arith.constant 0 : index
      %c0_34 = arith.constant 0 : index
      %34 = vector.load %arg10[%c0_33, %c0_34] : memref<4x4xf32, #tpu.memory_space<vmem>>, vector<4x4xf32>
      tpu.vector_store %arg10[%c0_33, %c0_34], %33 {strides = array<i32>} : memref<4x4xf32, #tpu.memory_space<vmem>>, vector<4x4xf32>,
    } else {
    }
    %c0 = arith.constant 0 : index
    %c0_1 = arith.constant 0 : index
    %3 = vector.load %arg2[%c0, %c0_1] : memref<4x256xf32, #tpu.memory_space<vmem>>, vector<4x256xf32>
    %4 = arith.truncf %3 : vector<4x256xf32> to vector<4x256xbf16>
    %c0_2 = arith.constant 0 : index
    %c0_3 = arith.constant 0 : index
    %5 = vector.load %arg7[%c0_2, %c0_3] : memref<4x1xf32, #tpu.memory_space<vmem>>, vector<4x1xf32>
    %cst = arith.constant dense<0x7F800000> : vector<4xf32>
    %6 = vector.multi_reduction <minimumf>, %3, %cst [1] : vector<4x256xf32> to vector<4xf32>
    %7 = vector.shape_cast %6 : vector<4xf32> to vector<4x1xf32>
    %8 = arith.minimumf %5, %7 : vector<4x1xf32>
    %c0_4 = arith.constant 0 : index
    %c0_5 = arith.constant 0 : index
    %9 = vector.load %arg7[%c0_4, %c0_5] : memref<4x1xf32, #tpu.memory_space<vmem>>, vector<4x1xf32>
    tpu.vector_store %arg7[%c0_4, %c0_5], %8 {strides = array<i32>} : memref<4x1xf32, #tpu.memory_space<vmem>>, vector<4x1xf32>,
    %c0_6 = arith.constant 0 : index
    %c0_7 = arith.constant 0 : index
    %10 = vector.load %arg8[%c0_6, %c0_7] : memref<4x1xf32, #tpu.memory_space<vmem>>, vector<4x1xf32>
    %cst_8 = arith.constant dense<0xFF800000> : vector<4xf32>
    %11 = vector.multi_reduction <maximumf>, %3, %cst_8 [1] : vector<4x256xf32> to vector<4xf32>
    %12 = vector.shape_cast %11 : vector<4xf32> to vector<4x1xf32>
    %13 = arith.maximumf %10, %12 : vector<4x1xf32>
    %c0_9 = arith.constant 0 : index
    %c0_10 = arith.constant 0 : index
    %14 = vector.load %arg8[%c0_9, %c0_10] : memref<4x1xf32, #tpu.memory_space<vmem>>, vector<4x1xf32>
    tpu.vector_store %arg8[%c0_9, %c0_10], %13 {strides = array<i32>} : memref<4x1xf32, #tpu.memory_space<vmem>>, vector<4x1xf32>,
    %c0_11 = arith.constant 0 : index
    %c0_12 = arith.constant 0 : index
    %15 = vector.load %arg9[%c0_11, %c0_12] : memref<4x1xf32, #tpu.memory_space<vmem>>, vector<4x1xf32>
    %cst_13 = arith.constant dense<0.000000e+00> : vector<4xf32>
    %16 = vector.multi_reduction <add>, %3, %cst_13 [1] : vector<4x256xf32> to vector<4xf32>
    %17 = vector.shape_cast %16 : vector<4xf32> to vector<4x1xf32>
    %18 = arith.addf %15, %17 : vector<4x1xf32>
    %c0_14 = arith.constant 0 : index
    %c0_15 = arith.constant 0 : index
    %19 = vector.load %arg9[%c0_14, %c0_15] : memref<4x1xf32, #tpu.memory_space<vmem>>, vector<4x1xf32>
    tpu.vector_store %arg9[%c0_14, %c0_15], %18 {strides = array<i32>} : memref<4x1xf32, #tpu.memory_space<vmem>>, vector<4x1xf32>,
    %c0_16 = arith.constant 0 : index
    %c0_17 = arith.constant 0 : index
    %20 = vector.load %arg10[%c0_16, %c0_17] : memref<4x4xf32, #tpu.memory_space<vmem>>, vector<4x4xf32>
    %cst_18 = arith.constant dense<0.000000e+00> : vector<4x4xf32>
    %21 = tpu.matmul %4, %4, %cst_18 {dimension_numbers = #tpu.dot_dimension_numbers<[1], [1], [0], [0], [0, 0, 1, 0], [], []>} : vector<4x256xbf16>, vector<4x256xbf16>, vector<4x4xf32> -> vector<4x4xf32>
    %22 = arith.addf %20, %21 : vector<4x4xf32>
    %c0_19 = arith.constant 0 : index
    %c0_20 = arith.constant 0 : index
    %23 = vector.load %arg10[%c0_19, %c0_20] : memref<4x4xf32, #tpu.memory_space<vmem>>, vector<4x4xf32>
    tpu.vector_store %arg10[%c0_19, %c0_20], %22 {strides = array<i32>} : memref<4x4xf32, #tpu.memory_space<vmem>>, vector<4x4xf32>,
    %c0_i32_21 = arith.constant 0 : i32
    %24 = arith.cmpi eq, %arg1, %c0_i32_21 : i32
    %25 = arith.extui %24 : i1 to i32
    %c0_i32_22 = arith.constant 0 : i32
    %26 = arith.cmpi ne, %25, %c0_i32_22 : i32
    scf.if %26 {
      %c0_23 = arith.constant 0 : index
      %c0_24 = arith.constant 0 : index
      %27 = vector.load %arg7[%c0_23, %c0_24] : memref<4x1xf32, #tpu.memory_space<vmem>>, vector<4x1xf32>
      %c0_25 = arith.constant 0 : index
      %c0_26 = arith.constant 0 : index
      %c0_27 = arith.constant 0 : index
      %28 = vector.load %arg3[%c0_25, %c0_26, %c0_27] : memref<1x4x1xf32, #tpu.memory_space<vmem>>, vector<1x4x1xf32>
      %29 = vector.shape_cast %28 : vector<1x4x1xf32> to vector<4x1xf32>
      %30 = vector.shape_cast %27 : vector<4x1xf32> to vector<1x4x1xf32>
      tpu.vector_store %arg3[%c0_25, %c0_26, %c0_27], %30 {strides = array<i32>} : memref<1x4x1xf32, #tpu.memory_space<vmem>>, vector<1x4x1xf32>,
      %c0_28 = arith.constant 0 : index
      %c0_29 = arith.constant 0 : index
      %31 = vector.load %arg8[%c0_28, %c0_29] : memref<4x1xf32, #tpu.memory_space<vmem>>, vector<4x1xf32>
      %c0_30 = arith.constant 0 : index
      %c0_31 = arith.constant 0 : index
      %c0_32 = arith.constant 0 : index
      %32 = vector.load %arg4[%c0_30, %c0_31, %c0_32] : memref<1x4x1xf32, #tpu.memory_space<vmem>>, vector<1x4x1xf32>
      %33 = vector.shape_cast %32 : vector<1x4x1xf32> to vector<4x1xf32>
      %34 = vector.shape_cast %31 : vector<4x1xf32> to vector<1x4x1xf32>
      tpu.vector_store %arg4[%c0_30, %c0_31, %c0_32], %34 {strides = array<i32>} : memref<1x4x1xf32, #tpu.memory_space<vmem>>, vector<1x4x1xf32>,
      %c0_33 = arith.constant 0 : index
      %c0_34 = arith.constant 0 : index
      %35 = vector.load %arg9[%c0_33, %c0_34] : memref<4x1xf32, #tpu.memory_space<vmem>>, vector<4x1xf32>
      %c0_35 = arith.constant 0 : index
      %c0_36 = arith.constant 0 : index
      %c0_37 = arith.constant 0 : index
      %36 = vector.load %arg5[%c0_35, %c0_36, %c0_37] : memref<1x4x1xf32, #tpu.memory_space<vmem>>, vector<1x4x1xf32>
      %37 = vector.shape_cast %36 : vector<1x4x1xf32> to vector<4x1xf32>
      %38 = vector.shape_cast %35 : vector<4x1xf32> to vector<1x4x1xf32>
      tpu.vector_store %arg5[%c0_35, %c0_36, %c0_37], %38 {strides = array<i32>} : memref<1x4x1xf32, #tpu.memory_space<vmem>>, vector<1x4x1xf32>,
      %c0_38 = arith.constant 0 : index
      %c0_39 = arith.constant 0 : index
      %39 = vector.load %arg10[%c0_38, %c0_39] : memref<4x4xf32, #tpu.memory_space<vmem>>, vector<4x4xf32>
      %c0_40 = arith.constant 0 : index
      %c0_41 = arith.constant 0 : index
      %c0_42 = arith.constant 0 : index
      %40 = vector.load %arg6[%c0_40, %c0_41, %c0_42] : memref<1x4x4xf32, #tpu.memory_space<vmem>>, vector<1x4x4xf32>
      %41 = vector.shape_cast %40 : vector<1x4x4xf32> to vector<4x4xf32>
      %42 = vector.shape_cast %39 : vector<4x4xf32> to vector<1x4x4xf32>
      tpu.vector_store %arg6[%c0_40, %c0_41, %c0_42], %42 {strides = array<i32>} : memref<1x4x4xf32, #tpu.memory_space<vmem>>, vector<1x4x4xf32>,
    } else {
    }
    return
  }
  func.func @transform_0(%arg0: i32, %arg1: i32) -> (i32, i32) {
    %c1_i32 = arith.constant 1 : i32
    %0 = arith.muli %arg0, %c1_i32 : i32
    %1 = arith.addi %0, %arg1 : i32
    %c0_i32 = arith.constant 0 : i32
    %2 = arith.minsi %1, %c0_i32 : i32
    %c0_i32_0 = arith.constant 0 : i32
    %c0_i32_1 = arith.constant 0 : i32
    return %c0_i32_0, %2 : i32, i32
  }
  func.func @transform_1(%arg0: i32, %arg1: i32) -> (i32, i32, i32) {
    %c0_i32 = arith.constant 0 : i32
    %c0_i32_0 = arith.constant 0 : i32
    %c0_i32_1 = arith.constant 0 : i32
    return %arg0, %c0_i32, %c0_i32_0 : i32, i32, i32
  }
  func.func @transform_2(%arg0: i32, %arg1: i32) -> (i32, i32, i32) {
    %c0_i32 = arith.constant 0 : i32
    %c0_i32_0 = arith.constant 0 : i32
    %c0_i32_1 = arith.constant 0 : i32
    return %arg0, %c0_i32, %c0_i32_0 : i32, i32, i32
  }
  func.func @transform_3(%arg0: i32, %arg1: i32) -> (i32, i32, i32) {
    %c0_i32 = arith.constant 0 : i32
    %c0_i32_0 = arith.constant 0 : i32
    %c0_i32_1 = arith.constant 0 : i32
    return %arg0, %c0_i32, %c0_i32_0 : i32, i32, i32
  }
  func.func @transform_4(%arg0: i32, %arg1: i32) -> (i32, i32, i32) {
    %c0_i32 = arith.constant 0 : i32
    %c0_i32_0 = arith.constant 0 : i32
    %c0_i32_1 = arith.constant 0 : i32
    return %arg0, %c0_i32, %c0_i32_0 : i32, i32, i32
  }
}

</mosaic_0001>

<bundles_post_ra>
// kernel: tpu_custom_call.1
= control target key start
LH: loop header
LB: loop body
LE: loop exit
PB: predicated region body
PF: predicated region fallthrough
CT: control target
= control target key end

     0   :  { %10 = vsyncpa [#allocation7], 0  ;;  %s269_s0 = inlined_call_operand.hbm [shape: f32[4,256], index: 0, kind: input, shape index: {}]   ;;  %s270_s1 = inlined_call_operand.vmem [shape: f32[1,4,1], index: 1, kind: output, shape index: {0}]   ;;  %s271_s2 = inlined_call_operand.vmem [shape: f32[1,4,1], index: 2, kind: output, shape index: {1}]   ;;  %s272_s3 = inlined_call_operand.vmem [shape: f32[1,4,1], index: 3, kind: output, shape index: {2}]   ;;  %s273_s4 = inlined_call_operand.hbm [shape: f32[1,4,4], index: 4, kind: output, shape index: {3}]  }
   0x1   :  { %11 = vsyncpa [#allocation8], 0  ;;  %s212_s15 = smov [#allocation6]  }
   0x2   :  { %s24_s16 = sshll.u32 %s212_s15, 4  ;;  %s25_s16 = int_to_ptr.vmem [resolvable:$true] %s24_s16 }
   0x3   :  { %s176_s17 = scalar_lea.vmem %s25_s16, 128  ;;  %p181_p1 = scmp.lt.s32.totalorder %s25_s16, %s25_s16 }
   0x4   :  { %p177_p0 = scmp.ne.s32.totalorder %s25_s16, %s176_s17  ;;  %p182_p2 = scmp.lt.s32.totalorder %s176_s17, %s176_s17 }
   0x6   :  { %p183_p3 = por %p182_p2, %p181_p1 }
   0x8   :  { %p184_p4 = pnand %p183_p3, %p177_p0 }
   0xa   :  { %187 = shalt.err (!%p184_p4)
}
   0xb   :  { %27 = dma.hbm_to_vmem [thread:$0]  %s269_s0, 128, %s25_s16, [#allocation7]  }
   0xc   :  { %208 = dma.done.wait [#allocation7], 128  }
   0xd   :  { %209 = vsyncadd [#allocation7], 4294967168  ;;  %vm40_vm0 = vcmask 3072   ;;  %v213_v0 = vmov inf   ;;  %vm53_vm1 = vcmask 1043456   ;;  %v46_v1 = vld [vmem:[#allocation6] sm:$0xff] }
   0xe   :  { %41 = vst.msk [vmem:[#allocation2] sm:$0xf] %vm40_vm0, %v213_v0  ;;  %v48_v2 = vcombine.high %v46_v1, %v46_v1  ;;  %v54_v3 = vsel %vm53_vm1, %v46_v1, inf  ;;  %v71_v4 = vsel %vm53_vm1, %v46_v1, 0.0  ;;  %v50_v5 = vpack.c.bf16 %v46_v1, %v46_v1 }
   0xf   :  { %v63_v6 = vsel %vm53_vm1, %v46_v1, -inf  ;;  %vm44_vm2 = vcmask 27648   ;;  %v214_v14 = vmov 0.0   ;;  %v215_v15 = vmov -inf  }
  0x10   :  { %v51_v7 = vpack.c.bf16 %v48_v2, %v48_v2  ;;  %v55_v8 = vsel %vm53_vm1, %v48_v2, inf  ;;  %v72_v9 = vsel %vm53_vm1, %v48_v2, 0.0  ;;  %v64_v10 = vsel %vm53_vm1, %v48_v2, -inf  ;;  %45 = vst.msk [vmem:[#allocation5] sm:$0xf] %vm44_vm2, %v214_v14 }
  0x11   :  { %v56_v11 = vmin.f32 %v54_v3, %v55_v8  ;;  %v73_v12 = vadd.f32 %v72_v9, %v71_v4  ;;  %v65_v13 = vmax.f32 %v63_v6, %v64_v10  ;;  %43 = vst.msk [vmem:[#allocation4] sm:$0xf] %vm40_vm0, %v214_v14  ;;  %42 = vst.msk [vmem:[#allocation3] sm:$0xf] %vm40_vm0, %v215_v15 }
  0x12   :  { %93 = vmatprep.subr.bf16.mxu0 %v51_v7  ;;  %111 = vmatprep.mubr.bf16.mxu0 %v51_v7 }
  0x13   :  { %94 = vmatpush1.bf16.xpose.msra.mxu0 %v50_v5  ;;  %57 = vmin.xlane.f32.xlu0 %v56_v11 }
  0x14   :  { %74 = vadd.xlane.f32.xlu1 %v73_v12 }
  0x15   :  { %v52_v16 = vld [vmem:[#allocation2] sm:$0xf] }
  0x17   :  { %66 = vmax.xlane.f32.xlu0 %v65_v13  ;;  %v78_v28 = vld [vmem:[#allocation5] sm:$0xf] }
  0x18   :  { %v70_v17 = vld [vmem:[#allocation4] sm:$0xf]  ;;  %v62_v22 = vld [vmem:[#allocation3] sm:$0xf] }
  0x1a   :  { %112 = vmatmul.mubr.bf16.vlgmr.msra.gmra.mxu0 %v50_v5 }
  0x9c   :  { %v58_v18 = vpop.xlane.xlu0 %57 }
  0x9d   :  { %v59_v19 = vmin.f32 %v52_v16, %v58_v18  ;;  %v75_v20 = vpop.xlane.xlu1 %74 }
  0x9e   :  { %v76_v21 = vadd.f32 %v75_v20, %v70_v17 }
  0x9f   :  { %61 = vst.msk [vmem:[#allocation2] sm:$0xf] %vm40_vm0, %v59_v19 }
  0xa0   :  { %77 = vst.msk [vmem:[#allocation4] sm:$0xf] %vm40_vm0, %v76_v21  ;;  %v67_v23 = vpop.xlane.xlu0 %66 }
  0xa1   :  { %v68_v24 = vmax.f32 %v62_v22, %v67_v23 }
  0xa3   :  { %69 = vst.msk [vmem:[#allocation3] sm:$0xf] %vm40_vm0, %v68_v24 }
  0xa6   :  { %v125_v25 = vld [vmem:[#allocation2] sm:$0xf] }
  0xa7   :  { %126 = vst.msk [vmem:[%s270_s1] sm:$0xf] %vm40_vm0, %v125_v25  ;;  %v129_v26 = vld [vmem:[#allocation4] sm:$0xf]  ;;  %s216_s1 = smov [#allocation9]  }
  0xa8   :  { %130 = vst.msk [vmem:[%s272_s3] sm:$0xf] %vm40_vm0, %v129_v26  ;;  %s145_s25 = sshll.u32 %s216_s1, 4  ;;  %s146_s25 = int_to_ptr.vmem [resolvable:$true] %s145_s25 }
  0xa9   :  { %s188_s3 = scalar_lea.vmem %s146_s25, 64  ;;  %p193_p6 = scmp.lt.s32.totalorder %s146_s25, %s146_s25 }
  0xaa   :  { %v127_v27 = vld [vmem:[#allocation3] sm:$0xf]  ;;  %p189_p5 = scmp.ne.s32.totalorder %s146_s25, %s188_s3  ;;  %p194_p7 = scmp.lt.s32.totalorder %s188_s3, %s188_s3 }
  0xab   :  { %128 = vst.msk [vmem:[%s271_s2] sm:$0xf] %vm40_vm0, %v127_v27 }
  0xac   :  { %p195_p8 = por %p194_p7, %p193_p6 }
  0xae   :  { %p196_p9 = pnand %p195_p8, %p189_p5 }
  0xda   :  { %v113_v29 = vpop.f32.mrf.mxu0 }
  0xdb   :  { %v119_v30 = vadd.f32 %v113_v29, %v78_v28 }
  0xdc   :  { %v115_v31 = vpop.f32.mrf.mxu0 }
  0xdd   :  { %121 = vst.msk [vmem:[#allocation5] sm:$0xf] %vm44_vm2, %v119_v30 }
  0xde   :  { %v116_v32 = vpop.f32.mrf.mxu0 }
  0xe0   :  { %v117_v33 = vpop.f32.mrf.mxu0 }
  0xe4   :  { %v131_v34 = vld [vmem:[#allocation5] sm:$0xf] }
  0xe5   :  { %132 = vst.msk [vmem:[#allocation9] sm:$0xf] %vm44_vm2, %v131_v34 }
  0xe6   :  { %199 = shalt.err (!%p196_p9)
}
  0xe7   :  { %148 = dma.vmem_to_hbm [thread:$0]  %s146_s25, 64, %s273_s4, [#allocation8]  }
  0xe8   :  { %210 = dma.done.wait [#allocation8], 64  }
  0xe9   :  { %211 = vsyncadd [#allocation8], 4294967232 }
  0xea   :  { %158 = vsyncpa [#allocation7], 1 }
  0xeb   :  { %159 = vsyncpa [#allocation8], 1 }

</bundles_post_ra>
